<compile_context>
chip_gen: v7x
topology: tpu7x:2x2x1
jax: 0.10.0
libtpu: 0.0.40
codegen_flags: <defaults>
</compile_context>

<pallas_src>
import functools

import jax
import jax.numpy as jnp
from jax.experimental import pallas as pl
from jax.experimental.pallas import tpu as pltpu

EPS = 1e-5


def net_kernel(x_ref, w1_ref, w2_ref, bn_ref, out_ref, *, n_blocks):
    x = x_ref[...].astype(jnp.float32)
    B, D = x.shape
    H = 2 * D
    inv_b = 1.0 / B

    # Statically unrolled chain of ResnetBlocks (n_blocks is small).
    for i in range(n_blocks):
        bn = bn_ref[i]                      # (4, H): [g1; bt1; g2(pad); bt2(pad)]
        g1, bt1 = bn[0:1, :], bn[1:2, :]    # (1, H)
        g2, bt2 = bn[2:3, :D], bn[3:4, :D]  # (1, D)

        # ---- Linear1: (B, D) @ (D, 2D).  Bias dropped: training-mode BN
        # subtracts the batch mean, so a constant bias cancels exactly. ----
        h = jnp.dot(x, w1_ref[i], preferred_element_type=jnp.float32)

        # ---- BatchNorm1d(2D): one fused reduction for sum and sum-of-squares
        stats = jnp.sum(jnp.concatenate([h, h * h], axis=1),
                        axis=0, keepdims=True)          # (1, 2H)
        mu1 = stats[:, :H] * inv_b
        var1 = jnp.maximum(stats[:, H:] * inv_b - mu1 * mu1, 0.0)  # biased var
        scale1 = g1 * jax.lax.rsqrt(var1 + EPS)
        shift1 = bt1 - mu1 * scale1
        # ---- ReLU ----
        h = jnp.maximum(h * scale1 + shift1, 0.0)

        # ---- Linear2: (B, 2D) @ (2D, D), bias dropped (same argument) ----
        h2 = jnp.dot(h, w2_ref[i], preferred_element_type=jnp.float32)

        # ---- BatchNorm1d(D): fused reduction ----
        stats2 = jnp.sum(jnp.concatenate([h2, h2 * h2], axis=1),
                         axis=0, keepdims=True)          # (1, 2D)
        mu2 = stats2[:, :D] * inv_b
        var2 = jnp.maximum(stats2[:, D:] * inv_b - mu2 * mu2, 0.0)
        scale2 = g2 * jax.lax.rsqrt(var2 + EPS)
        shift2 = bt2 - mu2 * scale2
        # ---- ReLU ----
        h2 = jnp.maximum(h2 * scale2 + shift2, 0.0)

        # ---- Skip connection ----
        x = x + h2

    out_ref[...] = x.astype(out_ref.dtype)


def _full_spec(shape):
    return pl.BlockSpec(shape, lambda: tuple(0 for _ in shape),
                        memory_space=pltpu.VMEM)


def net_forward_pallas(x, w1, w2, bn, n_blocks):
    """Run the whole Net (all blocks) as a single fused Pallas kernel."""
    B, D = x.shape
    H = 2 * D
    kernel = functools.partial(net_kernel, n_blocks=n_blocks)
    return pl.pallas_call(
        kernel,
        out_shape=jax.ShapeDtypeStruct((B, D), x.dtype),
        in_specs=[
            _full_spec((B, D)),              # x
            _full_spec((n_blocks, D, H)),    # w1 (stacked)
            _full_spec((n_blocks, H, D)),    # w2 (stacked)
            _full_spec((n_blocks, 4, H)),    # packed BN params
        ],
        out_specs=_full_spec((B, D)),
    )(x, w1, w2, bn)


@functools.partial(jax.jit, static_argnames=("n_blocks",))
def net_forward(x, w1, w2, bn, n_blocks):
    return net_forward_pallas(x, w1, w2, bn, n_blocks)


# ---------------------------------------------------------------------------
# Parameter construction (mirrors torch defaults: Linear U(-1/sqrt(fan_in),..),
# BatchNorm gamma=1 / beta=0).  Linear biases are generated (to mirror the
# torch module) but not fed to the kernel — training-mode BN cancels them.
# ---------------------------------------------------------------------------
def init_block_params(key, dim):
    k1, k2, k3, k4 = jax.random.split(key, 4)
    hid = 2 * dim
    lim1 = 1.0 / (dim ** 0.5)
    lim2 = 1.0 / (hid ** 0.5)
    return dict(
        w1=jax.random.uniform(k1, (dim, hid), jnp.float32, -lim1, lim1),
        b1=jax.random.uniform(k2, (1, hid), jnp.float32, -lim1, lim1),
        g1=jnp.ones((1, hid), jnp.float32),
        bt1=jnp.zeros((1, hid), jnp.float32),
        w2=jax.random.uniform(k3, (hid, dim), jnp.float32, -lim2, lim2),
        b2=jax.random.uniform(k4, (1, dim), jnp.float32, -lim2, lim2),
        g2=jnp.ones((1, dim), jnp.float32),
        bt2=jnp.zeros((1, dim), jnp.float32),
    )


def pack_params(per_block, dim):
    """Pack per-block params into 3 stacked arrays (fewer inputs / DMAs)."""
    hid = 2 * dim

    def pad(v):  # (1, dim) -> (1, hid)
        return jnp.pad(v, ((0, 0), (0, hid - v.shape[1])))

    w1 = jnp.stack([p["w1"] for p in per_block], axis=0)   # (n, D, 2D)
    w2 = jnp.stack([p["w2"] for p in per_block], axis=0)   # (n, 2D, D)
    bn = jnp.stack([
        jnp.concatenate([p["g1"], p["bt1"], pad(p["g2"]), pad(p["bt2"])], axis=0)
        for p in per_block
    ], axis=0)                                              # (n, 4, 2D)
    return w1, w2, bn


# Pure-JAX reference of the PyTorch forward (with biases, centered variance).
def net_forward_ref(x, per_block):
    def bn(h, g, b):
        mu = jnp.mean(h, axis=0, keepdims=True)
        var = jnp.mean((h - mu) ** 2, axis=0, keepdims=True)   # biased var
        return (h - mu) * jax.lax.rsqrt(var + EPS) * g + b

    for p in per_block:
        h = jnp.maximum(bn(x @ p["w1"] + p["b1"], p["g1"], p["bt1"]), 0.0)
        h = jnp.maximum(bn(h @ p["w2"] + p["b2"], p["g2"], p["bt2"]), 0.0)
        x = x + h
    return x


if __name__ == "__main__":
    # Small shapes consistent with the module: batch=8, input_dim=32, n_blocks=3.
    B, D, N_BLOCKS = 8, 32, 3

    key = jax.random.PRNGKey(0)
    kx, kp = jax.random.split(key)
    x = jax.random.normal(kx, (B, D), dtype=jnp.float32)

    block_keys = jax.random.split(kp, N_BLOCKS)
    per_block = [init_block_params(block_keys[i], D) for i in range(N_BLOCKS)]
    w1, w2, bn = pack_params(per_block, D)

    out = net_forward(x, w1, w2, bn, N_BLOCKS)
    jax.block_until_ready(out)

    ref = net_forward_ref(x, per_block)

    assert out.shape == (B, D) and out.dtype == jnp.float32
    assert bool(jnp.all(jnp.isfinite(out)))
    assert bool(jnp.allclose(out, ref, rtol=1e-4, atol=1e-4)), (
        float(jnp.max(jnp.abs(out - ref))))
    print("KERNEL_OK")
</pallas_src>

<mosaic_0001>
module attributes {stable_mosaic.version = 11 : i64} {
  func.func @net_kernel(%arg0: memref<8x32xf32, #tpu.memory_space<vmem>>, %arg1: memref<3x32x64xf32, #tpu.memory_space<vmem>>, %arg2: memref<3x64x32xf32, #tpu.memory_space<vmem>>, %arg3: memref<3x4x64xf32, #tpu.memory_space<vmem>>, %arg4: memref<8x32xf32, #tpu.memory_space<vmem>>) attributes {dimension_semantics = [], scalar_prefetch = 0 : i64, scratch_operands = 0 : i64, tpu.core_type = #tpu.core_type<tc>} {
    %c0 = arith.constant 0 : index
    %c0_0 = arith.constant 0 : index
    %0 = vector.load %arg0[%c0, %c0_0] : memref<8x32xf32, #tpu.memory_space<vmem>>, vector<8x32xf32>
    %c0_1 = arith.constant 0 : index
    %c0_2 = arith.constant 0 : index
    %c0_3 = arith.constant 0 : index
    %1 = vector.load %arg3[%c0_1, %c0_2, %c0_3] : memref<3x4x64xf32, #tpu.memory_space<vmem>>, vector<1x4x64xf32>
    %2 = vector.shape_cast %1 : vector<1x4x64xf32> to vector<4x64xf32>
    %3 = vector.extract_strided_slice %2 {offsets = [0, 0], sizes = [1, 64], strides = [1, 1]} : vector<4x64xf32> to vector<1x64xf32>
    %4 = vector.extract_strided_slice %2 {offsets = [1, 0], sizes = [1, 64], strides = [1, 1]} : vector<4x64xf32> to vector<1x64xf32>
    %5 = vector.extract_strided_slice %2 {offsets = [2, 0], sizes = [1, 32], strides = [1, 1]} : vector<4x64xf32> to vector<1x32xf32>
    %6 = vector.extract_strided_slice %2 {offsets = [3, 0], sizes = [1, 32], strides = [1, 1]} : vector<4x64xf32> to vector<1x32xf32>
    %c0_4 = arith.constant 0 : index
    %c0_5 = arith.constant 0 : index
    %c0_6 = arith.constant 0 : index
    %7 = vector.load %arg1[%c0_4, %c0_5, %c0_6] : memref<3x32x64xf32, #tpu.memory_space<vmem>>, vector<1x32x64xf32>
    %8 = vector.shape_cast %7 : vector<1x32x64xf32> to vector<32x64xf32>
    %cst = arith.constant dense<0.000000e+00> : vector<8x64xf32>
    %9 = tpu.matmul %0, %8, %cst {dimension_numbers = #tpu.dot_dimension_numbers<[1], [0], [0], [1], [0, 0, 1, 1], [], []>} : vector<8x32xf32>, vector<32x64xf32>, vector<8x64xf32> -> vector<8x64xf32>
    %10 = arith.mulf %9, %9 : vector<8x64xf32>
    %11 = tpu.concatenate %9, %10 in 1 : vector<8x64xf32>, vector<8x64xf32> -> vector<8x128xf32>
    %cst_7 = arith.constant dense<0.000000e+00> : vector<128xf32>
    %12 = vector.multi_reduction <add>, %11, %cst_7 [0] : vector<8x128xf32> to vector<128xf32>
    %13 = vector.shape_cast %12 : vector<128xf32> to vector<1x128xf32>
    %14 = vector.extract_strided_slice %13 {offsets = [0, 0], sizes = [1, 64], strides = [1, 1]} : vector<1x128xf32> to vector<1x64xf32>
    %cst_8 = arith.constant 1.250000e-01 : f32
    %15 = vector.broadcast %cst_8 : f32 to vector<1x64xf32>
    %16 = arith.mulf %14, %15 : vector<1x64xf32>
    %17 = vector.extract_strided_slice %13 {offsets = [0, 64], sizes = [1, 64], strides = [1, 1]} : vector<1x128xf32> to vector<1x64xf32>
    %cst_9 = arith.constant 1.250000e-01 : f32
    %18 = vector.broadcast %cst_9 : f32 to vector<1x64xf32>
    %19 = arith.mulf %17, %18 : vector<1x64xf32>
    %20 = arith.mulf %16, %16 : vector<1x64xf32>
    %21 = arith.subf %19, %20 : vector<1x64xf32>
    %cst_10 = arith.constant 0.000000e+00 : f32
    %22 = vector.broadcast %cst_10 : f32 to vector<1x64xf32>
    %23 = arith.maximumf %21, %22 : vector<1x64xf32>
    %cst_11 = arith.constant 9.99999974E-6 : f32
    %24 = vector.broadcast %cst_11 : f32 to vector<1x64xf32>
    %25 = arith.addf %23, %24 : vector<1x64xf32>
    %26 = math.rsqrt %25 : vector<1x64xf32>
    %27 = arith.mulf %3, %26 : vector<1x64xf32>
    %28 = arith.mulf %16, %27 : vector<1x64xf32>
    %29 = arith.subf %4, %28 : vector<1x64xf32>
    %30 = vector.broadcast %27 : vector<1x64xf32> to vector<8x64xf32>
    %31 = arith.mulf %9, %30 : vector<8x64xf32>
    %32 = vector.broadcast %29 : vector<1x64xf32> to vector<8x64xf32>
    %33 = arith.addf %31, %32 : vector<8x64xf32>
    %cst_12 = arith.constant 0.000000e+00 : f32
    %34 = vector.broadcast %cst_12 : f32 to vector<8x64xf32>
    %35 = arith.maximumf %33, %34 : vector<8x64xf32>
    %c0_13 = arith.constant 0 : index
    %c0_14 = arith.constant 0 : index
    %c0_15 = arith.constant 0 : index
    %36 = vector.load %arg2[%c0_13, %c0_14, %c0_15] : memref<3x64x32xf32, #tpu.memory_space<vmem>>, vector<1x64x32xf32>
    %37 = vector.shape_cast %36 : vector<1x64x32xf32> to vector<64x32xf32>
    %cst_16 = arith.constant dense<0.000000e+00> : vector<8x32xf32>
    %38 = tpu.matmul %35, %37, %cst_16 {dimension_numbers = #tpu.dot_dimension_numbers<[1], [0], [0], [1], [0, 0, 1, 1], [], []>} : vector<8x64xf32>, vector<64x32xf32>, vector<8x32xf32> -> vector<8x32xf32>
    %39 = arith.mulf %38, %38 : vector<8x32xf32>
    %40 = tpu.concatenate %38, %39 in 1 : vector<8x32xf32>, vector<8x32xf32> -> vector<8x64xf32>
    %cst_17 = arith.constant dense<0.000000e+00> : vector<64xf32>
    %41 = vector.multi_reduction <add>, %40, %cst_17 [0] : vector<8x64xf32> to vector<64xf32>
    %42 = vector.shape_cast %41 : vector<64xf32> to vector<1x64xf32>
    %43 = vector.extract_strided_slice %42 {offsets = [0, 0], sizes = [1, 32], strides = [1, 1]} : vector<1x64xf32> to vector<1x32xf32>
    %cst_18 = arith.constant 1.250000e-01 : f32
    %44 = vector.broadcast %cst_18 : f32 to vector<1x32xf32>
    %45 = arith.mulf %43, %44 : vector<1x32xf32>
    %46 = vector.extract_strided_slice %42 {offsets = [0, 32], sizes = [1, 32], strides = [1, 1]} : vector<1x64xf32> to vector<1x32xf32>
    %cst_19 = arith.constant 1.250000e-01 : f32
    %47 = vector.broadcast %cst_19 : f32 to vector<1x32xf32>
    %48 = arith.mulf %46, %47 : vector<1x32xf32>
    %49 = arith.mulf %45, %45 : vector<1x32xf32>
    %50 = arith.subf %48, %49 : vector<1x32xf32>
    %cst_20 = arith.constant 0.000000e+00 : f32
    %51 = vector.broadcast %cst_20 : f32 to vector<1x32xf32>
    %52 = arith.maximumf %50, %51 : vector<1x32xf32>
    %cst_21 = arith.constant 9.99999974E-6 : f32
    %53 = vector.broadcast %cst_21 : f32 to vector<1x32xf32>
    %54 = arith.addf %52, %53 : vector<1x32xf32>
    %55 = math.rsqrt %54 : vector<1x32xf32>
    %56 = arith.mulf %5, %55 : vector<1x32xf32>
    %57 = arith.mulf %45, %56 : vector<1x32xf32>
    %58 = arith.subf %6, %57 : vector<1x32xf32>
    %59 = vector.broadcast %56 : vector<1x32xf32> to vector<8x32xf32>
    %60 = arith.mulf %38, %59 : vector<8x32xf32>
    %61 = vector.broadcast %58 : vector<1x32xf32> to vector<8x32xf32>
    %62 = arith.addf %60, %61 : vector<8x32xf32>
    %cst_22 = arith.constant 0.000000e+00 : f32
    %63 = vector.broadcast %cst_22 : f32 to vector<8x32xf32>
    %64 = arith.maximumf %62, %63 : vector<8x32xf32>
    %65 = arith.addf %0, %64 : vector<8x32xf32>
    %c1 = arith.constant 1 : index
    %c0_23 = arith.constant 0 : index
    %c0_24 = arith.constant 0 : index
    %66 = vector.load %arg3[%c1, %c0_23, %c0_24] : memref<3x4x64xf32, #tpu.memory_space<vmem>>, vector<1x4x64xf32>
    %67 = vector.shape_cast %66 : vector<1x4x64xf32> to vector<4x64xf32>
    %68 = vector.extract_strided_slice %67 {offsets = [0, 0], sizes = [1, 64], strides = [1, 1]} : vector<4x64xf32> to vector<1x64xf32>
    %69 = vector.extract_strided_slice %67 {offsets = [1, 0], sizes = [1, 64], strides = [1, 1]} : vector<4x64xf32> to vector<1x64xf32>
    %70 = vector.extract_strided_slice %67 {offsets = [2, 0], sizes = [1, 32], strides = [1, 1]} : vector<4x64xf32> to vector<1x32xf32>
    %71 = vector.extract_strided_slice %67 {offsets = [3, 0], sizes = [1, 32], strides = [1, 1]} : vector<4x64xf32> to vector<1x32xf32>
    %c1_25 = arith.constant 1 : index
    %c0_26 = arith.constant 0 : index
    %c0_27 = arith.constant 0 : index
    %72 = vector.load %arg1[%c1_25, %c0_26, %c0_27] : memref<3x32x64xf32, #tpu.memory_space<vmem>>, vector<1x32x64xf32>
    %73 = vector.shape_cast %72 : vector<1x32x64xf32> to vector<32x64xf32>
    %cst_28 = arith.constant dense<0.000000e+00> : vector<8x64xf32>
    %74 = tpu.matmul %65, %73, %cst_28 {dimension_numbers = #tpu.dot_dimension_numbers<[1], [0], [0], [1], [0, 0, 1, 1], [], []>} : vector<8x32xf32>, vector<32x64xf32>, vector<8x64xf32> -> vector<8x64xf32>
    %75 = arith.mulf %74, %74 : vector<8x64xf32>
    %76 = tpu.concatenate %74, %75 in 1 : vector<8x64xf32>, vector<8x64xf32> -> vector<8x128xf32>
    %cst_29 = arith.constant dense<0.000000e+00> : vector<128xf32>
    %77 = vector.multi_reduction <add>, %76, %cst_29 [0] : vector<8x128xf32> to vector<128xf32>
    %78 = vector.shape_cast %77 : vector<128xf32> to vector<1x128xf32>
    %79 = vector.extract_strided_slice %78 {offsets = [0, 0], sizes = [1, 64], strides = [1, 1]} : vector<1x128xf32> to vector<1x64xf32>
    %cst_30 = arith.constant 1.250000e-01 : f32
    %80 = vector.broadcast %cst_30 : f32 to vector<1x64xf32>
    %81 = arith.mulf %79, %80 : vector<1x64xf32>
    %82 = vector.extract_strided_slice %78 {offsets = [0, 64], sizes = [1, 64], strides = [1, 1]} : vector<1x128xf32> to vector<1x64xf32>
    %cst_31 = arith.constant 1.250000e-01 : f32
    %83 = vector.broadcast %cst_31 : f32 to vector<1x64xf32>
    %84 = arith.mulf %82, %83 : vector<1x64xf32>
    %85 = arith.mulf %81, %81 : vector<1x64xf32>
    %86 = arith.subf %84, %85 : vector<1x64xf32>
    %cst_32 = arith.constant 0.000000e+00 : f32
    %87 = vector.broadcast %cst_32 : f32 to vector<1x64xf32>
    %88 = arith.maximumf %86, %87 : vector<1x64xf32>
    %cst_33 = arith.constant 9.99999974E-6 : f32
    %89 = vector.broadcast %cst_33 : f32 to vector<1x64xf32>
    %90 = arith.addf %88, %89 : vector<1x64xf32>
    %91 = math.rsqrt %90 : vector<1x64xf32>
    %92 = arith.mulf %68, %91 : vector<1x64xf32>
    %93 = arith.mulf %81, %92 : vector<1x64xf32>
    %94 = arith.subf %69, %93 : vector<1x64xf32>
    %95 = vector.broadcast %92 : vector<1x64xf32> to vector<8x64xf32>
    %96 = arith.mulf %74, %95 : vector<8x64xf32>
    %97 = vector.broadcast %94 : vector<1x64xf32> to vector<8x64xf32>
    %98 = arith.addf %96, %97 : vector<8x64xf32>
    %cst_34 = arith.constant 0.000000e+00 : f32
    %99 = vector.broadcast %cst_34 : f32 to vector<8x64xf32>
    %100 = arith.maximumf %98, %99 : vector<8x64xf32>
    %c1_35 = arith.constant 1 : index
    %c0_36 = arith.constant 0 : index
    %c0_37 = arith.constant 0 : index
    %101 = vector.load %arg2[%c1_35, %c0_36, %c0_37] : memref<3x64x32xf32, #tpu.memory_space<vmem>>, vector<1x64x32xf32>
    %102 = vector.shape_cast %101 : vector<1x64x32xf32> to vector<64x32xf32>
    %cst_38 = arith.constant dense<0.000000e+00> : vector<8x32xf32>
    %103 = tpu.matmul %100, %102, %cst_38 {dimension_numbers = #tpu.dot_dimension_numbers<[1], [0], [0], [1], [0, 0, 1, 1], [], []>} : vector<8x64xf32>, vector<64x32xf32>, vector<8x32xf32> -> vector<8x32xf32>
    %104 = arith.mulf %103, %103 : vector<8x32xf32>
    %105 = tpu.concatenate %103, %104 in 1 : vector<8x32xf32>, vector<8x32xf32> -> vector<8x64xf32>
    %cst_39 = arith.constant dense<0.000000e+00> : vector<64xf32>
    %106 = vector.multi_reduction <add>, %105, %cst_39 [0] : vector<8x64xf32> to vector<64xf32>
    %107 = vector.shape_cast %106 : vector<64xf32> to vector<1x64xf32>
    %108 = vector.extract_strided_slice %107 {offsets = [0, 0], sizes = [1, 32], strides = [1, 1]} : vector<1x64xf32> to vector<1x32xf32>
    %cst_40 = arith.constant 1.250000e-01 : f32
    %109 = vector.broadcast %cst_40 : f32 to vector<1x32xf32>
    %110 = arith.mulf %108, %109 : vector<1x32xf32>
    %111 = vector.extract_strided_slice %107 {offsets = [0, 32], sizes = [1, 32], strides = [1, 1]} : vector<1x64xf32> to vector<1x32xf32>
    %cst_41 = arith.constant 1.250000e-01 : f32
    %112 = vector.broadcast %cst_41 : f32 to vector<1x32xf32>
    %113 = arith.mulf %111, %112 : vector<1x32xf32>
    %114 = arith.mulf %110, %110 : vector<1x32xf32>
    %115 = arith.subf %113, %114 : vector<1x32xf32>
    %cst_42 = arith.constant 0.000000e+00 : f32
    %116 = vector.broadcast %cst_42 : f32 to vector<1x32xf32>
    %117 = arith.maximumf %115, %116 : vector<1x32xf32>
    %cst_43 = arith.constant 9.99999974E-6 : f32
    %118 = vector.broadcast %cst_43 : f32 to vector<1x32xf32>
    %119 = arith.addf %117, %118 : vector<1x32xf32>
    %120 = math.rsqrt %119 : vector<1x32xf32>
    %121 = arith.mulf %70, %120 : vector<1x32xf32>
    %122 = arith.mulf %110, %121 : vector<1x32xf32>
    %123 = arith.subf %71, %122 : vector<1x32xf32>
    %124 = vector.broadcast %121 : vector<1x32xf32> to vector<8x32xf32>
    %125 = arith.mulf %103, %124 : vector<8x32xf32>
    %126 = vector.broadcast %123 : vector<1x32xf32> to vector<8x32xf32>
    %127 = arith.addf %125, %126 : vector<8x32xf32>
    %cst_44 = arith.constant 0.000000e+00 : f32
    %128 = vector.broadcast %cst_44 : f32 to vector<8x32xf32>
    %129 = arith.maximumf %127, %128 : vector<8x32xf32>
    %130 = arith.addf %65, %129 : vector<8x32xf32>
    %c2 = arith.constant 2 : index
    %c0_45 = arith.constant 0 : index
    %c0_46 = arith.constant 0 : index
    %131 = vector.load %arg3[%c2, %c0_45, %c0_46] : memref<3x4x64xf32, #tpu.memory_space<vmem>>, vector<1x4x64xf32>
    %132 = vector.shape_cast %131 : vector<1x4x64xf32> to vector<4x64xf32>
    %133 = vector.extract_strided_slice %132 {offsets = [0, 0], sizes = [1, 64], strides = [1, 1]} : vector<4x64xf32> to vector<1x64xf32>
    %134 = vector.extract_strided_slice %132 {offsets = [1, 0], sizes = [1, 64], strides = [1, 1]} : vector<4x64xf32> to vector<1x64xf32>
    %135 = vector.extract_strided_slice %132 {offsets = [2, 0], sizes = [1, 32], strides = [1, 1]} : vector<4x64xf32> to vector<1x32xf32>
    %136 = vector.extract_strided_slice %132 {offsets = [3, 0], sizes = [1, 32], strides = [1, 1]} : vector<4x64xf32> to vector<1x32xf32>
    %c2_47 = arith.constant 2 : index
    %c0_48 = arith.constant 0 : index
    %c0_49 = arith.constant 0 : index
    %137 = vector.load %arg1[%c2_47, %c0_48, %c0_49] : memref<3x32x64xf32, #tpu.memory_space<vmem>>, vector<1x32x64xf32>
    %138 = vector.shape_cast %137 : vector<1x32x64xf32> to vector<32x64xf32>
    %cst_50 = arith.constant dense<0.000000e+00> : vector<8x64xf32>
    %139 = tpu.matmul %130, %138, %cst_50 {dimension_numbers = #tpu.dot_dimension_numbers<[1], [0], [0], [1], [0, 0, 1, 1], [], []>} : vector<8x32xf32>, vector<32x64xf32>, vector<8x64xf32> -> vector<8x64xf32>
    %140 = arith.mulf %139, %139 : vector<8x64xf32>
    %141 = tpu.concatenate %139, %140 in 1 : vector<8x64xf32>, vector<8x64xf32> -> vector<8x128xf32>
    %cst_51 = arith.constant dense<0.000000e+00> : vector<128xf32>
    %142 = vector.multi_reduction <add>, %141, %cst_51 [0] : vector<8x128xf32> to vector<128xf32>
    %143 = vector.shape_cast %142 : vector<128xf32> to vector<1x128xf32>
    %144 = vector.extract_strided_slice %143 {offsets = [0, 0], sizes = [1, 64], strides = [1, 1]} : vector<1x128xf32> to vector<1x64xf32>
    %cst_52 = arith.constant 1.250000e-01 : f32
    %145 = vector.broadcast %cst_52 : f32 to vector<1x64xf32>
    %146 = arith.mulf %144, %145 : vector<1x64xf32>
    %147 = vector.extract_strided_slice %143 {offsets = [0, 64], sizes = [1, 64], strides = [1, 1]} : vector<1x128xf32> to vector<1x64xf32>
    %cst_53 = arith.constant 1.250000e-01 : f32
    %148 = vector.broadcast %cst_53 : f32 to vector<1x64xf32>
    %149 = arith.mulf %147, %148 : vector<1x64xf32>
    %150 = arith.mulf %146, %146 : vector<1x64xf32>
    %151 = arith.subf %149, %150 : vector<1x64xf32>
    %cst_54 = arith.constant 0.000000e+00 : f32
    %152 = vector.broadcast %cst_54 : f32 to vector<1x64xf32>
    %153 = arith.maximumf %151, %152 : vector<1x64xf32>
    %cst_55 = arith.constant 9.99999974E-6 : f32
    %154 = vector.broadcast %cst_55 : f32 to vector<1x64xf32>
    %155 = arith.addf %153, %154 : vector<1x64xf32>
    %156 = math.rsqrt %155 : vector<1x64xf32>
    %157 = arith.mulf %133, %156 : vector<1x64xf32>
    %158 = arith.mulf %146, %157 : vector<1x64xf32>
    %159 = arith.subf %134, %158 : vector<1x64xf32>
    %160 = vector.broadcast %157 : vector<1x64xf32> to vector<8x64xf32>
    %161 = arith.mulf %139, %160 : vector<8x64xf32>
    %162 = vector.broadcast %159 : vector<1x64xf32> to vector<8x64xf32>
    %163 = arith.addf %161, %162 : vector<8x64xf32>
    %cst_56 = arith.constant 0.000000e+00 : f32
    %164 = vector.broadcast %cst_56 : f32 to vector<8x64xf32>
    %165 = arith.maximumf %163, %164 : vector<8x64xf32>
    %c2_57 = arith.constant 2 : index
    %c0_58 = arith.constant 0 : index
    %c0_59 = arith.constant 0 : index
    %166 = vector.load %arg2[%c2_57, %c0_58, %c0_59] : memref<3x64x32xf32, #tpu.memory_space<vmem>>, vector<1x64x32xf32>
    %167 = vector.shape_cast %166 : vector<1x64x32xf32> to vector<64x32xf32>
    %cst_60 = arith.constant dense<0.000000e+00> : vector<8x32xf32>
    %168 = tpu.matmul %165, %167, %cst_60 {dimension_numbers = #tpu.dot_dimension_numbers<[1], [0], [0], [1], [0, 0, 1, 1], [], []>} : vector<8x64xf32>, vector<64x32xf32>, vector<8x32xf32> -> vector<8x32xf32>
    %169 = arith.mulf %168, %168 : vector<8x32xf32>
    %170 = tpu.concatenate %168, %169 in 1 : vector<8x32xf32>, vector<8x32xf32> -> vector<8x64xf32>
    %cst_61 = arith.constant dense<0.000000e+00> : vector<64xf32>
    %171 = vector.multi_reduction <add>, %170, %cst_61 [0] : vector<8x64xf32> to vector<64xf32>
    %172 = vector.shape_cast %171 : vector<64xf32> to vector<1x64xf32>
    %173 = vector.extract_strided_slice %172 {offsets = [0, 0], sizes = [1, 32], strides = [1, 1]} : vector<1x64xf32> to vector<1x32xf32>
    %cst_62 = arith.constant 1.250000e-01 : f32
    %174 = vector.broadcast %cst_62 : f32 to vector<1x32xf32>
    %175 = arith.mulf %173, %174 : vector<1x32xf32>
    %176 = vector.extract_strided_slice %172 {offsets = [0, 32], sizes = [1, 32], strides = [1, 1]} : vector<1x64xf32> to vector<1x32xf32>
    %cst_63 = arith.constant 1.250000e-01 : f32
    %177 = vector.broadcast %cst_63 : f32 to vector<1x32xf32>
    %178 = arith.mulf %176, %177 : vector<1x32xf32>
    %179 = arith.mulf %175, %175 : vector<1x32xf32>
    %180 = arith.subf %178, %179 : vector<1x32xf32>
    %cst_64 = arith.constant 0.000000e+00 : f32
    %181 = vector.broadcast %cst_64 : f32 to vector<1x32xf32>
    %182 = arith.maximumf %180, %181 : vector<1x32xf32>
    %cst_65 = arith.constant 9.99999974E-6 : f32
    %183 = vector.broadcast %cst_65 : f32 to vector<1x32xf32>
    %184 = arith.addf %182, %183 : vector<1x32xf32>
    %185 = math.rsqrt %184 : vector<1x32xf32>
    %186 = arith.mulf %135, %185 : vector<1x32xf32>
    %187 = arith.mulf %175, %186 : vector<1x32xf32>
    %188 = arith.subf %136, %187 : vector<1x32xf32>
    %189 = vector.broadcast %186 : vector<1x32xf32> to vector<8x32xf32>
    %190 = arith.mulf %168, %189 : vector<8x32xf32>
    %191 = vector.broadcast %188 : vector<1x32xf32> to vector<8x32xf32>
    %192 = arith.addf %190, %191 : vector<8x32xf32>
    %cst_66 = arith.constant 0.000000e+00 : f32
    %193 = vector.broadcast %cst_66 : f32 to vector<8x32xf32>
    %194 = arith.maximumf %192, %193 : vector<8x32xf32>
    %195 = arith.addf %130, %194 : vector<8x32xf32>
    %c0_67 = arith.constant 0 : index
    %c0_68 = arith.constant 0 : index
    %196 = vector.load %arg4[%c0_67, %c0_68] : memref<8x32xf32, #tpu.memory_space<vmem>>, vector<8x32xf32>
    tpu.vector_store %arg4[%c0_67, %c0_68], %195 {strides = array<i32>} : memref<8x32xf32, #tpu.memory_space<vmem>>, vector<8x32xf32>,
    return
  }
}

</mosaic_0001>

<bundles_post_ra>
// kernel: net_forward.1
= control target key start
LH: loop header
LB: loop body
LE: loop exit
PB: predicated region body
PF: predicated region fallthrough
CT: control target
= control target key end

     0   :  { %v1047_v3 = vmov 0.0|0.0   ;;  %vm1048_vm0 = vmmov 0   ;;  %v1049_v6 = vmov 0.0   ;;  %s1307_s0 = inlined_call_operand.vmem [shape: f32[8,32], index: 0, kind: input, shape index: {}]   ;;  %s1308_s1 = inlined_call_operand.vmem [shape: f32[3,32,64], index: 1, kind: input, shape index: {}]   ;;  %s1309_s2 = inlined_call_operand.vmem [shape: f32[3,64,32], index: 2, kind: input, shape index: {}]   ;;  %s1310_s3 = inlined_call_operand.vmem [shape: f32[3,4,64], index: 3, kind: input, shape index: {}]   ;;  %s1311_s4 = inlined_call_operand.hbm [shape: f32[8,32], index: 4, kind: output, shape index: {}]  }
   0x1   :  { %v20_v0 = vld [vmem:[%s1308_s1] sm:$0xff]  ;;  %v21_v1 = vld [vmem:[%s1308_s1 + $0x8] sm:$0xff]  ;;  %v22_v2 = vld [vmem:[%s1308_s1 + $0x10] sm:$0xff]  ;;  %950 = vmatprep.subr.bf16.mxu0 %v1047_v3  ;;  %868 = vmatprep.mubr.msk.f32.mxu0 %vm1048_vm0, %v1049_v6 }
   0x2   :  { %v951_v4 = vpack.c.bf16 %v21_v1, %v20_v0  ;;  %v23_v5 = vld [vmem:[%s1308_s1 + $0x18] sm:$0xff] }
   0x3   :  { %9 = vsyncpa [#allocation3], 0  ;;  %956 = vmatprep.subr.bf16.mxu1 %v1047_v3  ;;  %887 = vmatprep.mubr.msk.f32.mxu1 %vm1048_vm0, %v1049_v6  ;;  %v954_v7 = vpack.c.bf16 %v23_v5, %v22_v2  ;;  %v1101_v8 = vld [vmem:[%s1307_s0] sm:$0xff]  ;;  %vm24_vm1 = vcmask 261120   ;;  %s1050_s25 = smov 64   ;;  %vm103_vm2 = vcmask 523264   ;;  %v131_v39 = vlaneseq }
   0x4   :  { %952 = vmatpush3.bf16.msra.mxu0 %v951_v4  ;;  %v142_v22 = vld [vmem:[%s1309_s2] sm:$0xff]  ;;  %v143_v23 = vld [vmem:[%s1309_s2 + $0x8] sm:$0xff]  ;;  %v144_v29 = vld [vmem:[%s1309_s2 + $0x10] sm:$0xff]  ;;  %s1051_s17 = smov 32   ;;  %s1052_s26 = smov 96  }
   0x5   :  { %953 = vmatprep.subr.bf16.mxu0 %v1047_v3  ;;  %v957_v24 = vpack.c.bf16 %v143_v23, %v142_v22  ;;  %v145_v30 = vld [vmem:[%s1309_s2 + $0x18] sm:$0xff]  ;;  %v146_v32 = vld [vmem:[%s1309_s2 + $0x20] sm:$0xff]  ;;  %v147_v33 = vld [vmem:[%s1309_s2 + $0x28] sm:$0xff]  ;;  %v132_v40 = vshrl.u32 %v131_v39, 7 }
   0x6   :  { %v960_v31 = vpack.c.bf16 %v145_v30, %v144_v29  ;;  %v963_v34 = vpack.c.bf16 %v147_v33, %v146_v32  ;;  %v148_v35 = vld [vmem:[%s1309_s2 + $0x30] sm:$0xff]  ;;  %v149_v36 = vld [vmem:[%s1309_s2 + $0x38] sm:$0xff]  ;;  %v19_v41 = vld [vmem:[%s1310_s3] sm:$0xf] }
   0x7   :  { %958 = vmatpush3.bf16.msra.mxu1 %v957_v24  ;;  %v966_v37 = vpack.c.bf16 %v149_v36, %v148_v35  ;;  %v1143_v43 = vsub.s32 0, %v132_v40  ;;  %v1145_v46 = vsub.s32 1, %v132_v40  ;;  %v1173_v23 = vsub.s32 3, %v132_v40 }
   0x8   :  { %955 = vmatpush3.bf16.msra.mxu0 %v954_v7  ;;  %959 = vmatprep.subr.bf16.mxu1 %v1047_v3 }
   0x9   :  { %968 = vmatprep.subr.bf16.mxu0 %v1047_v3 }
   0xb   :  { %869 = vmatmul.mubr.msk.f32.vlgmr.msra.gmra.mrb[0].mxu0 %vm24_vm1, %v1101_v8  ;;  %961 = vmatpush3.bf16.msra.mxu1 %v960_v31 }
   0xc   :  { %898 = vmatprep.mubr.msk.f32.mxu0 %vm1048_vm0, %v1049_v6  ;;  %962 = vmatprep.subr.bf16.mxu1 %v1047_v3 }
   0xf   :  { %964 = vmatpush3.bf16.msra.mxu1 %v963_v34 }
  0x10   :  { %965 = vmatprep.subr.bf16.mxu1 %v1047_v3 }
  0x13   :  { %967 = vmatpush3.bf16.msra.mxu1 %v966_v37 }
  0x14   :  { %986 = vmatprep.subr.bf16.mxu1 %v1047_v3 }
  0xde   :  { %v94_v9 = vpop.f32.mrb[0].mxu0 }
  0xdf   :  { %v870_v10 = vpop.f32.mrb[1].mxu0  ;;  %v98_v11 = vmul.f32 %v94_v9, %v94_v9 }
  0xe1   :  { %100 = vrot.lane.b32.xlu0 %v98_v11, %s1050_s25  ;;  %v789_v11 = vld [vmem:[%s1308_s1 + $0x20] sm:$0xff] }
 0x153   :  { %v101_v12 = vpop.permute.xlu0 %100 }
 0x154   :  { %v104_v13 = vsel %vm103_vm2, %v94_v9, %v101_v12  ;;  %v790_v12 = vld [vmem:[%s1308_s1 + $0x28] sm:$0xff] }
 0x155   :  { %v105_v14 = vrot.slane %v104_v13, 4 }
 0x157   :  { %v106_v15 = vadd.f32 %v105_v14, %v104_v13  ;;  %v969_v13 = vpack.c.bf16 %v790_v12, %v789_v11 }
 0x159   :  { %v107_v16 = vrot.slane %v106_v15, 2  ;;  %970 = vmatpush3.bf16.msra.mxu0 %v969_v13 }
 0x15a   :  { %971 = vmatprep.subr.bf16.mxu0 %v1047_v3 }
 0x15b   :  { %v108_v17 = vadd.f32 %v107_v16, %v106_v15  ;;  %v791_v15 = vld [vmem:[%s1308_s1 + $0x30] sm:$0xff]  ;;  %v792_v16 = vld [vmem:[%s1308_s1 + $0x38] sm:$0xff] }
 0x15d   :  { %v109_v18 = vrot.slane %v108_v17, 1 }
 0x15f   :  { %v110_v19 = vadd.f32 %v109_v18, %v108_v17  ;;  %v972_v18 = vpack.c.bf16 %v792_v16, %v791_v15 }
 0x161   :  { %v111_v20 = vmul.f32 0.125, %v110_v19  ;;  %973 = vmatpush3.bf16.msra.mxu0 %v972_v18 }
 0x162   :  { %974 = vmatprep.subr.bf16.mxu0 %v1047_v3 }
 0x163   :  { %v112_v21 = vmul.f32 %v111_v20, %v111_v20 }
 0x165   :  { %114 = vrot.lane.b32.xlu0 %v112_v21, %s1050_s25 }
 0x1d7   :  { %v115_v25 = vpop.permute.xlu0 %114 }
 0x1d8   :  { %v117_v26 = vsub.f32 %v111_v20, %v115_v25 }
 0x1da   :  { %v118_v27 = vmax.f32 %v117_v26, 0.0 }
 0x1dc   :  { %v119_v28 = vadd.f32 1e-05, %v118_v27 }
 0x1de   :  { %1011 = vrsqrt.f32 %v119_v28 }
 0x1e8   :  { %v1012_v38 = vpop.eup %1011 }
 0x1e9   :  { %122 = vrot.lane.b32.xlu1 %v1012_v38, %s1050_s25 }
 0x25b   :  { %v123_v42 = vpop.permute.xlu1 %122 }
 0x25c   :  { %v125_v44 = vmul.f32 %v123_v42, %v19_v41 }
 0x25e   :  { %v126_v45 = vmul.f32 %v125_v44, %v111_v20  ;;  %v134_v48 = vrot.slane %v125_v44, %v1143_v43  ;;  %v1171_v20 = vsub.s32 2, %v132_v40 }
 0x260   :  { %v128_v47 = vrot.slane %v126_v45, 7  ;;  %v135_v50 = vmul.f32 %v134_v48, %v94_v9  ;;  %v794_v45 = vld [vmem:[%s1309_s2 + $0x40] sm:$0xff] }
 0x262   :  { %v130_v49 = vsub.f32 %v19_v41, %v128_v47  ;;  %v795_v47 = vld [vmem:[%s1309_s2 + $0x48] sm:$0xff] }
 0x263   :  { %v975_v48 = vpack.c.bf16 %v795_v47, %v794_v45 }
 0x264   :  { %v139_v51 = vrot.slane %v130_v49, %v1145_v46 }
 0x266   :  { %v140_v52 = vadd.f32 %v139_v51, %v135_v50 }
 0x268   :  { %v141_v53 = vmax.f32 %v140_v52, 0.0 }
 0x26a   :  { %888 = vmatmul.mubr.msk.f32.vlgmr.msra.gmra.mrb[0].mxu1 %vm103_vm2, %v141_v53  ;;  %v796_v53 = vld [vmem:[%s1309_s2 + $0x50] sm:$0xff] }
 0x26b   :  { %928 = vmatprep.mubr.msk.f32.mxu1 %vm1048_vm0, %v1049_v6 }
 0x33d   :  { %v219_v54 = vpop.f32.mrb[0].mxu1 }
 0x33e   :  { %v223_v55 = vmul.f32 %v219_v54, %v219_v54  ;;  %v889_v56 = vpop.f32.mrb[1].mxu1 }
 0x33f   :  { %v798_v56 = vld [vmem:[%s1309_s2 + $0x60] sm:$0xff] }
 0x340   :  { %225 = vrot.lane.b32.xlu1 %v223_v55, %s1051_s17 }
 0x3b2   :  { %v226_v57 = vpop.permute.xlu1 %225 }
 0x3b3   :  { %v228_v58 = vsel %vm24_vm1, %v219_v54, %v226_v57  ;;  %v799_v57 = vld [vmem:[%s1309_s2 + $0x68] sm:$0xff] }
 0x3b4   :  { %v229_v59 = vsel %vm103_vm2, %v228_v58, 0.0  ;;  %v981_v58 = vpack.c.bf16 %v799_v57, %v798_v56 }
 0x3b5   :  { %v230_v60 = vrot.slane %v229_v59, 4 }
 0x3b7   :  { %v231_v61 = vadd.f32 %v230_v60, %v229_v59  ;;  %v800_v59 = vld [vmem:[%s1309_s2 + $0x70] sm:$0xff]  ;;  %v801_v60 = vld [vmem:[%s1309_s2 + $0x78] sm:$0xff] }
 0x3b9   :  { %v232_v62 = vrot.slane %v231_v61, 2 }
 0x3bb   :  { %v233_v63 = vadd.f32 %v232_v62, %v231_v61  ;;  %v984_v61 = vpack.c.bf16 %v801_v60, %v800_v59 }
 0x3bd   :  { %v234_v0 = vrot.slane %v233_v63, 1 }
 0x3bf   :  { %v235_v1 = vadd.f32 %v234_v0, %v233_v63  ;;  %v788_v63 = vld [vmem:[%s1310_s3 + $0x4] sm:$0xf] }
 0x3c1   :  { %v236_v2 = vmul.f32 0.125, %v235_v1 }
 0x3c3   :  { %v237_v4 = vmul.f32 %v236_v2, %v236_v2 }
 0x3c5   :  { %239 = vrot.lane.b32.xlu0 %v237_v4, %s1051_s17 }
 0x437   :  { %v240_v5 = vpop.permute.xlu0 %239 }
 0x438   :  { %v242_v7 = vsub.f32 %v236_v2, %v240_v5 }
 0x43a   :  { %v243_v9 = vmax.f32 %v242_v7, 0.0 }
 0x43c   :  { %v244_v10 = vadd.f32 1e-05, %v243_v9 }
 0x43e   :  { %1013 = vrsqrt.f32 %v244_v10 }
 0x448   :  { %v1014_v14 = vpop.eup %1013 }
 0x449   :  { %v247_v17 = vrot.slane %v1014_v14, 6 }
 0x44b   :  { %248 = vrot.lane.b32.xlu1 %v247_v17, %s1052_s26 }
 0x4bd   :  { %v249_v19 = vpop.permute.xlu1 %248 }
 0x4be   :  { %v251_v21 = vmul.f32 %v249_v19, %v19_v41 }
 0x4c0   :  { %v252_v22 = vmul.f32 %v251_v21, %v236_v2  ;;  %v260_v25 = vrot.slane %v251_v21, %v1171_v20 }
 0x4c2   :  { %v254_v24 = vrot.slane %v252_v22, 7  ;;  %v261_v27 = vmul.f32 %v260_v25, %v219_v54  ;;  %v797_v54 = vld [vmem:[%s1309_s2 + $0x58] sm:$0xff] }
 0x4c3   :  { %v978_v55 = vpack.c.bf16 %v797_v54, %v796_v53 }
 0x4c4   :  { %v256_v26 = vsub.f32 %v19_v41, %v254_v24 }
 0x4c6   :  { %v265_v28 = vrot.slane %v256_v26, %v1173_v23 }
 0x4c8   :  { %v266_v29 = vadd.f32 %v265_v28, %v261_v27 }
 0x4ca   :  { %v267_v30 = vmax.f32 %v266_v29, 0.0 }
 0x4cc   :  { %v1178_v31 = vadd.f32 %v267_v30, %v1101_v8 }
 0x4ce   :  { %899 = vmatmul.mubr.msk.f32.vlgmr.msra.gmra.mrb[2].mxu0 %vm24_vm1, %v1178_v31 }
 0x4cf   :  { %917 = vmatprep.mubr.msk.f32.mxu0 %vm1048_vm0, %v1049_v6  ;;  %976 = vmatpush3.bf16.msra.mxu0 %v975_v48 }
 0x4d0   :  { %977 = vmatprep.subr.bf16.mxu0 %v1047_v3 }
 0x4d3   :  { %979 = vmatpush3.bf16.msra.mxu0 %v978_v55 }
 0x4d4   :  { %980 = vmatprep.subr.bf16.mxu0 %v1047_v3 }
 0x4d7   :  { %982 = vmatpush3.bf16.msra.mxu0 %v981_v58 }
 0x4d8   :  { %983 = vmatprep.subr.bf16.mxu0 %v1047_v3 }
 0x4db   :  { %985 = vmatpush3.bf16.msra.mxu0 %v984_v61 }
 0x5a1   :  { %v345_v32 = vpop.f32.mrb[2].mxu0 }
 0x5a2   :  { %v349_v33 = vmul.f32 %v345_v32, %v345_v32  ;;  %v900_v34 = vpop.f32.mrb[3].mxu0 }
 0x5a3   :  { %v804_v34 = vld [vmem:[%s1308_s1 + $0x40] sm:$0xff] }
 0x5a4   :  { %351 = vrot.lane.b32.xlu0 %v349_v33, %s1050_s25 }
 0x616   :  { %v352_v35 = vpop.permute.xlu0 %351 }
 0x617   :  { %v354_v36 = vsel %vm103_vm2, %v345_v32, %v352_v35  ;;  %v805_v35 = vld [vmem:[%s1308_s1 + $0x48] sm:$0xff] }
 0x618   :  { %v355_v37 = vrot.slane %v354_v36, 4 }
 0x61a   :  { %v356_v38 = vadd.f32 %v355_v37, %v354_v36  ;;  %v987_v36 = vpack.c.bf16 %v805_v35, %v804_v34 }
 0x61c   :  { %v357_v39 = vrot.slane %v356_v38, 2  ;;  %988 = vmatpush3.bf16.msra.mxu1 %v987_v36 }
 0x61d   :  { %989 = vmatprep.subr.bf16.mxu1 %v1047_v3 }
 0x61e   :  { %v358_v40 = vadd.f32 %v357_v39, %v356_v38  ;;  %v806_v38 = vld [vmem:[%s1308_s1 + $0x50] sm:$0xff]  ;;  %v807_v39 = vld [vmem:[%s1308_s1 + $0x58] sm:$0xff] }
 0x620   :  { %v359_v8 = vrot.slane %v358_v40, 1 }
 0x622   :  { %v360_v41 = vadd.f32 %v359_v8, %v358_v40  ;;  %v990_v8 = vpack.c.bf16 %v807_v39, %v806_v38 }
 0x624   :  { %v361_v42 = vmul.f32 0.125, %v360_v41  ;;  %991 = vmatpush3.bf16.msra.mxu1 %v990_v8 }
 0x625   :  { %992 = vmatprep.subr.bf16.mxu1 %v1047_v3 }
 0x626   :  { %v362_v44 = vmul.f32 %v361_v42, %v361_v42 }
 0x628   :  { %364 = vrot.lane.b32.xlu1 %v362_v44, %s1050_s25 }
 0x69a   :  { %v365_v49 = vpop.permute.xlu1 %364 }
 0x69b   :  { %v367_v50 = vsub.f32 %v361_v42, %v365_v49 }
 0x69d   :  { %v368_v51 = vmax.f32 %v367_v50, 0.0 }
 0x69f   :  { %v369_v52 = vadd.f32 1e-05, %v368_v51 }
 0x6a1   :  { %1015 = vrsqrt.f32 %v369_v52 }
 0x6ab   :  { %v1016_v62 = vpop.eup %1015 }
 0x6ac   :  { %372 = vrot.lane.b32.xlu0 %v1016_v62, %s1050_s25 }
 0x71e   :  { %v373_v0 = vpop.permute.xlu0 %372 }
 0x71f   :  { %v375_v1 = vmul.f32 %v788_v63, %v373_v0 }
 0x721   :  { %v376_v2 = vmul.f32 %v375_v1, %v361_v42  ;;  %v384_v5 = vrot.slane %v375_v1, %v1143_v43 }
 0x723   :  { %v378_v4 = vrot.slane %v376_v2, 7  ;;  %v385_v9 = vmul.f32 %v384_v5, %v345_v32  ;;  %v810_v2 = vld [vmem:[%s1309_s2 + $0x88] sm:$0xff] }
 0x725   :  { %v380_v7 = vsub.f32 %v788_v63, %v378_v4 }
 0x727   :  { %v389_v10 = vrot.slane %v380_v7, %v1145_v46 }
 0x729   :  { %v390_v11 = vadd.f32 %v389_v10, %v385_v9 }
 0x72b   :  { %v391_v12 = vmax.f32 %v390_v11, 0.0  ;;  %v811_v11 = vld [vmem:[%s1309_s2 + $0x90] sm:$0xff] }
 0x72d   :  { %918 = vmatmul.mubr.msk.f32.vlgmr.msra.gmra.mrb[4].mxu0 %vm103_vm2, %v391_v12  ;;  %v812_v12 = vld [vmem:[%s1309_s2 + $0x98] sm:$0xff] }
 0x800   :  { %v470_v13 = vpop.f32.mrb[4].mxu0 }
 0x801   :  { %v474_v14 = vmul.f32 %v470_v13, %v470_v13  ;;  %v919_v15 = vpop.f32.mrb[5].mxu0 }
 0x802   :  { %v814_v15 = vld [vmem:[%s1309_s2 + $0xa8] sm:$0xff] }
 0x803   :  { %476 = vrot.lane.b32.xlu1 %v474_v14, %s1051_s17  ;;  %v813_v14 = vld [vmem:[%s1309_s2 + $0xa0] sm:$0xff] }
 0x875   :  { %v477_v16 = vpop.permute.xlu1 %476 }
 0x876   :  { %v479_v17 = vsel %vm24_vm1, %v470_v13, %v477_v16  ;;  %v999_v16 = vpack.c.bf16 %v814_v15, %v813_v14 }
 0x877   :  { %v480_v18 = vsel %vm103_vm2, %v479_v17, 0.0  ;;  %v815_v17 = vld [vmem:[%s1309_s2 + $0xb0] sm:$0xff] }
 0x878   :  { %v481_v19 = vrot.slane %v480_v18, 4 }
 0x87a   :  { %v482_v21 = vadd.f32 %v481_v19, %v480_v18  ;;  %v816_v18 = vld [vmem:[%s1309_s2 + $0xb8] sm:$0xff] }
 0x87b   :  { %v1002_v19 = vpack.c.bf16 %v816_v18, %v815_v17 }
 0x87c   :  { %v483_v22 = vrot.slane %v482_v21, 2 }
 0x87e   :  { %v484_v24 = vadd.f32 %v483_v22, %v482_v21  ;;  %v803_v22 = vld [vmem:[%s1310_s3 + $0x8] sm:$0xf] }
 0x880   :  { %v485_v25 = vrot.slane %v484_v24, 1 }
 0x882   :  { %v486_v26 = vadd.f32 %v485_v25, %v484_v24 }
 0x884   :  { %v487_v27 = vmul.f32 0.125, %v486_v26 }
 0x886   :  { %v488_v28 = vmul.f32 %v487_v27, %v487_v27 }
 0x888   :  { %490 = vrot.lane.b32.xlu0 %v488_v28, %s1051_s17 }
 0x8fa   :  { %v491_v29 = vpop.permute.xlu0 %490 }
 0x8fb   :  { %v493_v30 = vsub.f32 %v487_v27, %v491_v29 }
 0x8fd   :  { %v494_v32 = vmax.f32 %v493_v30, 0.0 }
 0x8ff   :  { %v495_v33 = vadd.f32 1e-05, %v494_v32 }
 0x901   :  { %1017 = vrsqrt.f32 %v495_v33 }
 0x90b   :  { %v1018_v37 = vpop.eup %1017 }
 0x90c   :  { %v498_v40 = vrot.slane %v1018_v37, 6 }
 0x90e   :  { %499 = vrot.lane.b32.xlu1 %v498_v40, %s1052_s26 }
 0x980   :  { %v500_v41 = vpop.permute.xlu1 %499 }
 0x981   :  { %v502_v42 = vmul.f32 %v788_v63, %v500_v41 }
 0x983   :  { %v503_v44 = vmul.f32 %v502_v42, %v487_v27  ;;  %v511_v47 = vrot.slane %v502_v42, %v1171_v20 }
 0x985   :  { %v505_v45 = vrot.slane %v503_v44, 7  ;;  %v512_v49 = vmul.f32 %v511_v47, %v470_v13  ;;  %v996_v13 = vpack.c.bf16 %v812_v12, %v811_v11 }
 0x987   :  { %v507_v48 = vsub.f32 %v788_v63, %v505_v45 }
 0x989   :  { %v516_v50 = vrot.slane %v507_v48, %v1173_v23 }
 0x98b   :  { %v517_v51 = vadd.f32 %v516_v50, %v512_v49 }
 0x98d   :  { %v518_v52 = vmax.f32 %v517_v51, 0.0 }
 0x98f   :  { %v1243_v53 = vadd.f32 %v518_v52, %v1178_v31 }
 0x991   :  { %929 = vmatmul.mubr.msk.f32.vlgmr.msra.gmra.mrb[2].mxu1 %vm24_vm1, %v1243_v53 }
 0x992   :  { %947 = vmatprep.mubr.msk.f32.mxu1 %vm1048_vm0, %v1049_v6  ;;  %v809_v6 = vld [vmem:[%s1309_s2 + $0x80] sm:$0xff]  ;;  %s1053_s2 = smov [#allocation2]  }
 0x993   :  { %v993_v4 = vpack.c.bf16 %v810_v2, %v809_v6  ;;  %s778_s3 = sshll.u32 %s1053_s2, 4  ;;  %s779_s3 = int_to_ptr.vmem [resolvable:$true] %s778_s3 }
 0x994   :  { %p1028_p1 = scmp.lt.s32.totalorder %s779_s3, %s779_s3 }
 0x995   :  { %994 = vmatpush3.bf16.msra.mxu1 %v993_v4 }
 0x996   :  { %995 = vmatprep.subr.bf16.mxu1 %v1047_v3 }
 0x999   :  { %997 = vmatpush3.bf16.msra.mxu1 %v996_v13 }
 0x99a   :  { %998 = vmatprep.subr.bf16.mxu1 %v1047_v3 }
 0x99d   :  { %1000 = vmatpush3.bf16.msra.mxu1 %v999_v16 }
 0x99e   :  { %1001 = vmatprep.subr.bf16.mxu1 %v1047_v3 }
 0x9a1   :  { %1003 = vmatpush3.bf16.msra.mxu1 %v1002_v19 }
 0xa64   :  { %v596_v54 = vpop.f32.mrb[2].mxu1 }
 0xa65   :  { %v600_v55 = vmul.f32 %v596_v54, %v596_v54  ;;  %v930_v56 = vpop.f32.mrb[3].mxu1 }
 0xa67   :  { %602 = vrot.lane.b32.xlu0 %v600_v55, %s1050_s25 }
 0xad9   :  { %v603_v57 = vpop.permute.xlu0 %602 }
 0xada   :  { %v605_v58 = vsel %vm103_vm2, %v596_v54, %v603_v57 }
 0xadb   :  { %v606_v59 = vrot.slane %v605_v58, 4 }
 0xadd   :  { %v607_v60 = vadd.f32 %v606_v59, %v605_v58 }
 0xadf   :  { %v608_v61 = vrot.slane %v607_v60, 2 }
 0xae1   :  { %v609_v62 = vadd.f32 %v608_v61, %v607_v60 }
 0xae3   :  { %v610_v31 = vrot.slane %v609_v62, 1 }
 0xae5   :  { %v611_v63 = vadd.f32 %v610_v31, %v609_v62 }
 0xae7   :  { %v612_v0 = vmul.f32 0.125, %v611_v63 }
 0xae9   :  { %v613_v1 = vmul.f32 %v612_v0, %v612_v0 }
 0xaeb   :  { %615 = vrot.lane.b32.xlu1 %v613_v1, %s1050_s25 }
 0xb5d   :  { %v616_v5 = vpop.permute.xlu1 %615 }
 0xb5e   :  { %v618_v7 = vsub.f32 %v612_v0, %v616_v5 }
 0xb60   :  { %v619_v9 = vmax.f32 %v618_v7, 0.0 }
 0xb62   :  { %v620_v10 = vadd.f32 1e-05, %v619_v9 }
 0xb64   :  { %1019 = vrsqrt.f32 %v620_v10 }
 0xb6e   :  { %v1020_v21 = vpop.eup %1019 }
 0xb6f   :  { %623 = vrot.lane.b32.xlu0 %v1020_v21, %s1050_s25  ;;  %s1023_s25 = scalar_lea.vmem %s779_s3, 128 }
 0xb70   :  { %p1024_p0 = scmp.ne.s32.totalorder %s779_s3, %s1023_s25  ;;  %p1029_p2 = scmp.lt.s32.totalorder %s1023_s25, %s1023_s25 }
 0xb72   :  { %p1030_p3 = por %p1029_p2, %p1028_p1 }
 0xb74   :  { %p1031_p4 = pnand %p1030_p3, %p1024_p0 }
 0xbe1   :  { %v624_v24 = vpop.permute.xlu0 %623 }
 0xbe2   :  { %v626_v25 = vmul.f32 %v803_v22, %v624_v24 }
 0xbe4   :  { %v627_v3 = vmul.f32 %v626_v25, %v612_v0  ;;  %v635_v27 = vrot.slane %v626_v25, %v1143_v43 }
 0xbe6   :  { %v629_v26 = vrot.slane %v627_v3, 7  ;;  %v636_v29 = vmul.f32 %v635_v27, %v596_v54 }
 0xbe8   :  { %v631_v28 = vsub.f32 %v803_v22, %v629_v26 }
 0xbea   :  { %v640_v30 = vrot.slane %v631_v28, %v1145_v46 }
 0xbec   :  { %v641_v32 = vadd.f32 %v640_v30, %v636_v29 }
 0xbee   :  { %v642_v33 = vmax.f32 %v641_v32, 0.0 }
 0xbf0   :  { %948 = vmatmul.mubr.msk.f32.vlgmr.msra.gmra.mrb[4].mxu1 %vm103_vm2, %v642_v33 }
 0xcc3   :  { %v721_v34 = vpop.f32.mrb[4].mxu1 }
 0xcc4   :  { %v725_v35 = vmul.f32 %v721_v34, %v721_v34  ;;  %v949_v36 = vpop.f32.mrb[5].mxu1 }
 0xcc6   :  { %727 = vrot.lane.b32.xlu1 %v725_v35, %s1051_s17 }
 0xd38   :  { %v728_v37 = vpop.permute.xlu1 %727 }
 0xd39   :  { %v730_v38 = vsel %vm24_vm1, %v721_v34, %v728_v37 }
 0xd3a   :  { %v731_v39 = vsel %vm103_vm2, %v730_v38, 0.0 }
 0xd3b   :  { %v732_v40 = vrot.slane %v731_v39, 4 }
 0xd3d   :  { %v733_v43 = vadd.f32 %v732_v40, %v731_v39 }
 0xd3f   :  { %v734_v8 = vrot.slane %v733_v43, 2 }
 0xd41   :  { %v735_v41 = vadd.f32 %v734_v8, %v733_v43 }
 0xd43   :  { %v736_v42 = vrot.slane %v735_v41, 1 }
 0xd45   :  { %v737_v46 = vadd.f32 %v736_v42, %v735_v41 }
 0xd47   :  { %v738_v44 = vmul.f32 0.125, %v737_v46 }
 0xd49   :  { %v739_v45 = vmul.f32 %v738_v44, %v738_v44 }
 0xd4b   :  { %741 = vrot.lane.b32.xlu0 %v739_v45, %s1051_s17 }
 0xdbd   :  { %v742_v47 = vpop.permute.xlu0 %741 }
 0xdbe   :  { %v744_v48 = vsub.f32 %v738_v44, %v742_v47 }
 0xdc0   :  { %v745_v49 = vmax.f32 %v744_v48, 0.0 }
 0xdc2   :  { %v746_v50 = vadd.f32 1e-05, %v745_v49 }
 0xdc4   :  { %1021 = vrsqrt.f32 %v746_v50 }
 0xdce   :  { %v1022_v51 = vpop.eup %1021 }
 0xdcf   :  { %v749_v52 = vrot.slane %v1022_v51, 6 }
 0xdd1   :  { %750 = vrot.lane.b32.xlu1 %v749_v52, %s1052_s26 }
 0xe43   :  { %v751_v54 = vpop.permute.xlu1 %750 }
 0xe44   :  { %v753_v55 = vmul.f32 %v803_v22, %v751_v54 }
 0xe46   :  { %v754_v56 = vmul.f32 %v753_v55, %v738_v44  ;;  %v762_v58 = vrot.slane %v753_v55, %v1171_v20 }
 0xe48   :  { %v756_v57 = vrot.slane %v754_v56, 7  ;;  %v763_v60 = vmul.f32 %v762_v58, %v721_v34 }
 0xe4a   :  { %v758_v59 = vsub.f32 %v803_v22, %v756_v57 }
 0xe4c   :  { %v767_v61 = vrot.slane %v758_v59, %v1173_v23 }
 0xe4e   :  { %v768_v62 = vadd.f32 %v767_v61, %v763_v60 }
 0xe50   :  { %v769_v31 = vmax.f32 %v768_v62, 0.0 }
 0xe52   :  { %v770_v63 = vadd.f32 %v769_v31, %v1243_v53 }
 0xe54   :  { %771 = vst.msk [vmem:[#allocation2] sm:$0xff] %vm24_vm1, %v770_v63 }
 0xe55   :  { %1034 = shalt.err (!%p1031_p4)
}
 0xe56   :  { %s1035_s21 = scalar_lea.hbm %s1311_s4, 128 }
 0xe57   :  { %p1036_p5 = scmp.ne.s32.totalorder %s1311_s4, %s1035_s21  ;;  %p1039_p6 = scmp.lt.u32.totalorder %s1035_s21, %s1311_s4 }
 0xe59   :  { %p1041_p7 = pnand %p1039_p6, %p1036_p5 }
 0xe5b   :  { %1044 = shalt.err (!%p1041_p7)
}
 0xe5c   :  { %781 = dma.vmem_to_hbm [thread:$0]  %s779_s3, 128, %s1311_s4, [#allocation3]  }
 0xe5d   :  { %1045 = dma.done.wait [#allocation3], 128  }
 0xe5e   :  { %1046 = vsyncadd [#allocation3], 4294967168 }
 0xe5f   :  { %785 = vsyncpa [#allocation3], 1 }

</bundles_post_ra>
